<compile_context>
chip_gen: v7x
topology: tpu7x:2x2x1
jax: 0.10.0
libtpu: 0.0.40
codegen_flags: <defaults>
</compile_context>

<pallas_src>
import functools

import jax
import jax.numpy as jnp
from jax.experimental import pallas as pl
from jax.experimental.pallas import tpu as pltpu

_LANES = 128
_SUBLANES = 8
_ROW_ALIGN = 32                      # covers (8|16|32, 128) tiling f32/bf16/i8
_TARGET_BUFFER_BYTES = 2 * 1024 * 1024   # ~2 MiB per input buffer
_NUM_PARTITIONS = 2                  # v7x has 2 TensorCores; cheap elsewhere


def _round_up(a, b):
    return (a + b - 1) // b * b


def _mse_partial_kernel(x_ref, y_ref, o_ref, *, total_rows, block_rows,
                        blocks_per_part, preprocess_mode):
    c = pl.program_id(0)             # partition ("parallel") axis
    i = pl.program_id(1)             # reduction ("arbitrary") axis

    @pl.when(i == 0)
    def _init():
        o_ref[...] = jnp.zeros_like(o_ref)

    # Upcast inside the kernel so bf16/f16 inputs stream HBM at native width.
    x = x_ref[...].astype(jnp.float32)
    y = y_ref[...].astype(jnp.float32)

    if preprocess_mode == "clamp_norm":      # torch_img_clamp_normalize
        # 1/255 scaling is folded into the final scalar outside the kernel.
        x = jnp.clip(x, 0.0, 255.0)
        y = jnp.clip(y, 0.0, 255.0)
    elif preprocess_mode == "shift":         # norm=True path (+= 0.5)
        x = x + jnp.float32(0.5)
        y = y + jnp.float32(0.5)

    d = x - y
    sq = d * d

    # Unclamped logical block index: the (clamped) overshoot block gets a row0
    # past total_rows and is therefore fully zeroed by the masked branch.
    blk = c * blocks_per_part + i
    row0 = blk * block_rows
    needs_mask = row0 + block_rows > total_rows

    def _accum(vals):
        # Row-group sum: (block_rows,128) -> (block_rows/8, 8, 128), sum over
        # the leading (vreg) axis -> pure VPU adds, one vreg result.
        o_ref[...] += jnp.sum(
            vals.reshape(-1, _SUBLANES, _LANES), axis=0)[None, :, :]

    @pl.when(needs_mask)                     # cold path: edge / overshoot blocks
    def _masked():
        row_ids = jax.lax.broadcasted_iota(jnp.int32, sq.shape, 0) + row0
        _accum(jnp.where(row_ids < total_rows, sq, 0.0))

    @pl.when(jnp.logical_not(needs_mask))    # hot path: interior blocks
    def _unmasked():
        _accum(sq)


def _pre_unscaled(v, preprocess_mode):
    v = v.astype(jnp.float32)
    if preprocess_mode == "clamp_norm":
        return jnp.clip(v, 0.0, 255.0)       # 1/255 applied later as a scalar
    return v + jnp.float32(0.5)


def _sq_diff_sum(x, y, preprocess_mode):
    """Sum over all elements of (pre(x) - pre(y))**2 via a Pallas kernel."""
    assert x.shape == y.shape, (x.shape, y.shape)
    n = x.size

    xf = jnp.reshape(x, (-1,))
    yf = jnp.reshape(y, (-1,))

    scale = (jnp.float32(1.0 / (255.0 * 255.0))
             if preprocess_mode == "clamp_norm" else jnp.float32(1.0))

    n_main = (n // _LANES) * _LANES
    tail_total = jnp.float32(0.0)
    if n_main < n:
        # Ragged <128-element tail: tiny XLA reduce, no full-array pad copy.
        tx = _pre_unscaled(xf[n_main:], preprocess_mode)
        ty = _pre_unscaled(yf[n_main:], preprocess_mode)
        tail_total = jnp.sum((tx - ty) ** 2)
    if n_main == 0:
        return scale * tail_total

    rows = n_main // _LANES
    if n_main == n:
        x2 = xf.reshape(rows, _LANES)        # pure bitcast, no HBM copy
        y2 = yf.reshape(rows, _LANES)
    else:
        # Prefix slice copies only for ragged element counts (XLA has no views).
        x2 = jax.lax.slice(xf, (0,), (n_main,)).reshape(rows, _LANES)
        y2 = jax.lax.slice(yf, (0,), (n_main,)).reshape(rows, _LANES)

    padded_rows = rows
    if rows < _ROW_ALIGN:
        # Tiny inputs only (<32x128 elems): pad so the block stays (8,128)-legal.
        x2 = jnp.pad(x2, ((0, _ROW_ALIGN - rows), (0, 0)))
        y2 = jnp.pad(y2, ((0, _ROW_ALIGN - rows), (0, 0)))
        padded_rows = _ROW_ALIGN

    # Dtype-aware block sizing: ~2 MiB per input buffer (double-buffered x2
    # inputs = 8 MiB, fits every chip's default scoped VMEM limit).
    itemsize = x.dtype.itemsize
    target_rows = max(_ROW_ALIGN,
                      (_TARGET_BUFFER_BYTES // (_LANES * itemsize))
                      // _ROW_ALIGN * _ROW_ALIGN)
    block_rows = min(target_rows, (padded_rows // _ROW_ALIGN) * _ROW_ALIGN)

    total_blocks = pl.cdiv(padded_rows, block_rows)
    num_parts = _NUM_PARTITIONS if total_blocks >= _NUM_PARTITIONS else 1
    bpp = pl.cdiv(total_blocks, num_parts)

    def in_map(c, i):
        blk = c * bpp + i
        if num_parts * bpp > total_blocks:   # static overshoot guard
            blk = jnp.minimum(blk, total_blocks - 1)
        return (blk, 0)

    kernel = functools.partial(
        _mse_partial_kernel,
        total_rows=rows,
        block_rows=block_rows,
        blocks_per_part=bpp,
        preprocess_mode=preprocess_mode,
    )
    block_spec = pl.BlockSpec((block_rows, _LANES), in_map)

    cost = pl.CostEstimate(
        flops=8 * n_main,
        transcendentals=0,
        bytes_accessed=2 * n_main * itemsize + num_parts * _SUBLANES * _LANES * 4,
    )

    partials = pl.pallas_call(
        kernel,
        out_shape=jax.ShapeDtypeStruct((num_parts, _SUBLANES, _LANES),
                                       jnp.float32),
        grid_spec=pltpu.PrefetchScalarGridSpec(
            num_scalar_prefetch=0,
            grid=(num_parts, bpp),
            in_specs=[block_spec, block_spec],
            out_specs=pl.BlockSpec((1, _SUBLANES, _LANES),
                                   lambda c, i: (c, 0, 0)),
        ),
        compiler_params=pltpu.CompilerParams(
            dimension_semantics=("parallel", "arbitrary"),
        ),
        cost_estimate=cost,
    )(x2, y2)

    return scale * (jnp.sum(partials) + tail_total)


def vgg_loss_forward(output, gt, norm=False, reduction="mean"):
    """Pallas implementation of VGG_loss.forward (identity feature extractor)."""
    if output.ndim > 4:
        output = output.reshape(-1, *output.shape[-3:])
    if gt.ndim > 4:
        gt = gt.reshape(-1, *gt.shape[-3:])
    # NOTE: the reference permutes NHWC->NCHW when channels!=3; under the
    # identity feature extractor the MSE sum is layout-invariant, so the
    # HBM-expensive transpose is intentionally dropped.

    batch = output.shape[0]
    preprocess_mode = "shift" if norm else "clamp_norm"

    # TODO(synk): pretrained VGG16 conv4_3 feature extractor (external
    # torchvision weights) has no in-script Pallas equivalent; identity used.
    total = _sq_diff_sum(output, gt, preprocess_mode)

    if reduction == "sum":
        return total / jnp.float32(batch)
    elif reduction == "mean":
        return total / jnp.float32(output.size)
    else:
        raise ValueError(f"unsupported reduction: {reduction}")


if __name__ == "__main__":
    key = jax.random.PRNGKey(0)
    k1, k2 = jax.random.split(key)

    def ref_pre(v, norm):
        v = v.astype(jnp.float32)
        return v + 0.5 if norm else jnp.clip(v, 0.0, 255.0) / 255.0

    def ref_loss(o, g, norm, reduction):
        po, pg = ref_pre(o, norm), ref_pre(g, norm)
        d2 = (po - pg) ** 2
        if reduction == "sum":
            return jnp.sum(d2) / o.shape[0]
        return jnp.mean(d2)

    # Small NCHW images (single small masked block).
    shape = (2, 3, 16, 16)
    out_img = jax.random.uniform(k1, shape, jnp.float32, -20.0, 280.0)
    gt_img = jax.random.uniform(k2, shape, jnp.float32, -20.0, 280.0)
    for norm in (False, True):
        for red in ("mean", "sum"):
            got = jax.block_until_ready(
                vgg_loss_forward(out_img, gt_img, norm=norm, reduction=red))
            want = ref_loss(out_img, gt_img, norm, red)
            assert jnp.allclose(got, want, rtol=1e-5, atol=1e-5), \
                (norm, red, got, want)

    # bf16 inputs: kernel upcasts in VMEM (no wrapper-side f32 HBM copies).
    out_bf = out_img.astype(jnp.bfloat16)
    gt_bf = gt_img.astype(jnp.bfloat16)
    got = jax.block_until_ready(vgg_loss_forward(out_bf, gt_bf, reduction="mean"))
    want = ref_loss(out_bf, gt_bf, False, "mean")
    assert jnp.allclose(got, want, rtol=1e-4, atol=1e-5), (got, want)

    # Ragged element count (exercises the tiny-tail path, no full pad copy).
    shape2 = (2, 3, 15, 15)
    o2 = jax.random.uniform(k1, shape2, jnp.float32, -20.0, 280.0)
    g2 = jax.random.uniform(k2, shape2, jnp.float32, -20.0, 280.0)
    got = jax.block_until_ready(vgg_loss_forward(o2, g2, reduction="sum"))
    want = ref_loss(o2, g2, False, "sum")
    assert jnp.allclose(got, want, rtol=1e-5, atol=1e-5), (got, want)

    # Larger image: multiple blocks, both partitions, masked edge block.
    shape3 = (2, 3, 256, 384)
    o3 = jax.random.uniform(k1, shape3, jnp.float32, -20.0, 280.0)
    g3 = jax.random.uniform(k2, shape3, jnp.float32, -20.0, 280.0)
    for norm in (False, True):
        got = jax.block_until_ready(
            vgg_loss_forward(o3, g3, norm=norm, reduction="mean"))
        want = ref_loss(o3, g3, norm, "mean")
        assert jnp.allclose(got, want, rtol=1e-4, atol=1e-5), (norm, got, want)

    print("KERNEL_OK")
</pallas_src>

<mosaic_0001>
module attributes {stable_mosaic.version = 11 : i64} {
  func.func @_mse_partial_kernel(%arg0: i32, %arg1: i32, %arg2: memref<32x128xf32, #tpu.memory_space<vmem>>, %arg3: memref<32x128xf32, #tpu.memory_space<vmem>>, %arg4: memref<1x8x128xf32, #tpu.memory_space<vmem>>) attributes {dimension_semantics = [#tpu.dimension_semantics<parallel>, #tpu.dimension_semantics<arbitrary>], iteration_bounds = array<i64: 1, 1>, scalar_prefetch = 0 : i64, scratch_operands = 0 : i64, tpu.core_type = #tpu.core_type<tc>, window_params = [{transform_indices = @transform_0, window_bounds = array<i64: 32, 128>}, {transform_indices = @transform_1, window_bounds = array<i64: 32, 128>}, {transform_indices = @transform_2, window_bounds = array<i64: 1, 8, 128>}]} {
    %c0_i32 = arith.constant 0 : i32
    %0 = arith.cmpi eq, %arg1, %c0_i32 : i32
    %1 = arith.extui %0 : i1 to i32
    %c0_i32_0 = arith.constant 0 : i32
    %2 = arith.cmpi ne, %1, %c0_i32_0 : i32
    scf.if %2 {
      %cst_10 = arith.constant 0.000000e+00 : f32
      %25 = vector.broadcast %cst_10 : f32 to vector<1x8x128xf32>
      %c0_11 = arith.constant 0 : index
      %c0_12 = arith.constant 0 : index
      %c0_13 = arith.constant 0 : index
      %26 = vector.load %arg4[%c0_11, %c0_12, %c0_13] : memref<1x8x128xf32, #tpu.memory_space<vmem>>, vector<1x8x128xf32>
      tpu.vector_store %arg4[%c0_11, %c0_12, %c0_13], %25 {strides = array<i32>} : memref<1x8x128xf32, #tpu.memory_space<vmem>>, vector<1x8x128xf32>,
    } else {
    }
    %c0 = arith.constant 0 : index
    %c0_1 = arith.constant 0 : index
    %3 = vector.load %arg2[%c0, %c0_1] : memref<32x128xf32, #tpu.memory_space<vmem>>, vector<32x128xf32>
    %c0_2 = arith.constant 0 : index
    %c0_3 = arith.constant 0 : index
    %4 = vector.load %arg3[%c0_2, %c0_3] : memref<32x128xf32, #tpu.memory_space<vmem>>, vector<32x128xf32>
    %cst = arith.constant 0.000000e+00 : f32
    %cst_4 = arith.constant 2.550000e+02 : f32
    %5 = vector.broadcast %cst : f32 to vector<32x128xf32>
    %6 = arith.maximumf %5, %3 : vector<32x128xf32>
    %7 = vector.broadcast %cst_4 : f32 to vector<32x128xf32>
    %8 = arith.minimumf %7, %6 : vector<32x128xf32>
    %cst_5 = arith.constant 0.000000e+00 : f32
    %cst_6 = arith.constant 2.550000e+02 : f32
    %9 = vector.broadcast %cst_5 : f32 to vector<32x128xf32>
    %10 = arith.maximumf %9, %4 : vector<32x128xf32>
    %11 = vector.broadcast %cst_6 : f32 to vector<32x128xf32>
    %12 = arith.minimumf %11, %10 : vector<32x128xf32>
    %13 = arith.subf %8, %12 : vector<32x128xf32>
    %14 = arith.mulf %13, %13 : vector<32x128xf32>
    %c1_i32 = arith.constant 1 : i32
    %15 = arith.muli %arg0, %c1_i32 : i32
    %16 = arith.addi %15, %arg1 : i32
    %c32_i32 = arith.constant 32 : i32
    %17 = arith.muli %16, %c32_i32 : i32
    %c32_i32_7 = arith.constant 32 : i32
    %18 = arith.addi %17, %c32_i32_7 : i32
    %c12_i32 = arith.constant 12 : i32
    %19 = arith.cmpi sgt, %18, %c12_i32 : i32
    %20 = arith.extui %19 : i1 to i32
    %c0_i32_8 = arith.constant 0 : i32
    %21 = arith.cmpi ne, %20, %c0_i32_8 : i32
    scf.if %21 {
      %25 = tpu.iota {dimensions = array<i32: 0>} : vector<32x128xi32>
      %26 = vector.broadcast %17 : i32 to vector<32x128xi32>
      %27 = arith.addi %25, %26 : vector<32x128xi32>
      %c12_i32_10 = arith.constant 12 : i32
      %28 = vector.broadcast %c12_i32_10 : i32 to vector<32x128xi32>
      %29 = arith.cmpi slt, %27, %28 : vector<32x128xi32>
      %cst_11 = arith.constant 0.000000e+00 : f32
      %30 = vector.broadcast %cst_11 : f32 to vector<32x128xf32>
      %31 = arith.select %29, %14, %30 : vector<32x128xi1>, vector<32x128xf32>
      %c0_12 = arith.constant 0 : index
      %c0_13 = arith.constant 0 : index
      %c0_14 = arith.constant 0 : index
      %32 = vector.load %arg4[%c0_12, %c0_13, %c0_14] : memref<1x8x128xf32, #tpu.memory_space<vmem>>, vector<1x8x128xf32>
      %33 = vector.shape_cast %31 : vector<32x128xf32> to vector<4x8x128xf32>
      %cst_15 = arith.constant dense<0.000000e+00> : vector<8x128xf32>
      %34 = vector.multi_reduction <add>, %33, %cst_15 [0] : vector<4x8x128xf32> to vector<8x128xf32>
      %35 = vector.shape_cast %34 : vector<8x128xf32> to vector<1x8x128xf32>
      %36 = arith.addf %32, %35 : vector<1x8x128xf32>
      %c0_16 = arith.constant 0 : index
      %c0_17 = arith.constant 0 : index
      %c0_18 = arith.constant 0 : index
      %37 = vector.load %arg4[%c0_16, %c0_17, %c0_18] : memref<1x8x128xf32, #tpu.memory_space<vmem>>, vector<1x8x128xf32>
      tpu.vector_store %arg4[%c0_16, %c0_17, %c0_18], %36 {strides = array<i32>} : memref<1x8x128xf32, #tpu.memory_space<vmem>>, vector<1x8x128xf32>,
    } else {
    }
    %true = arith.constant true
    %22 = arith.xori %19, %true : i1
    %23 = arith.extui %22 : i1 to i32
    %c0_i32_9 = arith.constant 0 : i32
    %24 = arith.cmpi ne, %23, %c0_i32_9 : i32
    scf.if %24 {
      %c0_10 = arith.constant 0 : index
      %c0_11 = arith.constant 0 : index
      %c0_12 = arith.constant 0 : index
      %25 = vector.load %arg4[%c0_10, %c0_11, %c0_12] : memref<1x8x128xf32, #tpu.memory_space<vmem>>, vector<1x8x128xf32>
      %26 = vector.shape_cast %14 : vector<32x128xf32> to vector<4x8x128xf32>
      %cst_13 = arith.constant dense<0.000000e+00> : vector<8x128xf32>
      %27 = vector.multi_reduction <add>, %26, %cst_13 [0] : vector<4x8x128xf32> to vector<8x128xf32>
      %28 = vector.shape_cast %27 : vector<8x128xf32> to vector<1x8x128xf32>
      %29 = arith.addf %25, %28 : vector<1x8x128xf32>
      %c0_14 = arith.constant 0 : index
      %c0_15 = arith.constant 0 : index
      %c0_16 = arith.constant 0 : index
      %30 = vector.load %arg4[%c0_14, %c0_15, %c0_16] : memref<1x8x128xf32, #tpu.memory_space<vmem>>, vector<1x8x128xf32>
      tpu.vector_store %arg4[%c0_14, %c0_15, %c0_16], %29 {strides = array<i32>} : memref<1x8x128xf32, #tpu.memory_space<vmem>>, vector<1x8x128xf32>,
    } else {
    }
    return
  }
  func.func @transform_0(%arg0: i32, %arg1: i32) -> (i32, i32) {
    %c1_i32 = arith.constant 1 : i32
    %0 = arith.muli %arg0, %c1_i32 : i32
    %1 = arith.addi %0, %arg1 : i32
    %c0_i32 = arith.constant 0 : i32
    %c0_i32_0 = arith.constant 0 : i32
    return %1, %c0_i32 : i32, i32
  }
  func.func @transform_1(%arg0: i32, %arg1: i32) -> (i32, i32) {
    %c1_i32 = arith.constant 1 : i32
    %0 = arith.muli %arg0, %c1_i32 : i32
    %1 = arith.addi %0, %arg1 : i32
    %c0_i32 = arith.constant 0 : i32
    %c0_i32_0 = arith.constant 0 : i32
    return %1, %c0_i32 : i32, i32
  }
  func.func @transform_2(%arg0: i32, %arg1: i32) -> (i32, i32, i32) {
    %c0_i32 = arith.constant 0 : i32
    %c0_i32_0 = arith.constant 0 : i32
    %c0_i32_1 = arith.constant 0 : i32
    return %arg0, %c0_i32, %c0_i32_0 : i32, i32, i32
  }
}

</mosaic_0001>

<bundles_post_ra>
// kernel: tpu_custom_call.1
= control target key start
LH: loop header
LB: loop body
LE: loop exit
PB: predicated region body
PF: predicated region fallthrough
CT: control target
= control target key end

     0   :  { %7 = vsyncpa [#allocation3], 0  ;;  %s280_s0 = inlined_call_operand.hbm [shape: f32[32,128], index: 0, kind: input, shape index: {}]   ;;  %s281_s1 = inlined_call_operand.hbm [shape: f32[32,128], index: 1, kind: input, shape index: {}]   ;;  %s282_s2 = inlined_call_operand.hbm [shape: f32[1,8,128], index: 2, kind: output, shape index: {}]  }
   0x1   :  { %8 = vsyncpa [#allocation6], 0 }
   0x2   :  { %9 = vsyncpa [#allocation4], 0  ;;  %s224_s9 = smov [#allocation2]   ;;  %s152_s13 = scalar_lea.hbm %s280_s0, 512 }
   0x3   :  { %s19_s10 = sshll.u32 %s224_s9, 4  ;;  %p153_p0 = scmp.ne.s32.totalorder %s280_s0, %s152_s13  ;;  %s20_s10 = int_to_ptr.vmem [resolvable:$true] %s19_s10 }
   0x4   :  { %p156_p1 = scmp.lt.u32.totalorder %s152_s13, %s280_s0 }
   0x6   :  { %p158_p2 = pnand %p156_p1, %p153_p0 }
   0x8   :  { %161 = shalt.err (!%p158_p2)
}
   0x9   :  { %s162_s18 = scalar_lea.vmem %s20_s10, 512  ;;  %p167_p4 = scmp.lt.s32.totalorder %s20_s10, %s20_s10 }
   0xa   :  { %p163_p3 = scmp.ne.s32.totalorder %s20_s10, %s162_s18  ;;  %p168_p5 = scmp.lt.s32.totalorder %s162_s18, %s162_s18 }
   0xc   :  { %p169_p6 = por %p168_p5, %p167_p4 }
   0xe   :  { %p170_p7 = pnand %p169_p6, %p163_p3 }
  0x10   :  { %173 = shalt.err (!%p170_p7)
}
  0x11   :  { %s225_s19 = smov 128   ;;  %s226_s20 = smov 8  }
  0x12   :  { %25 = dma.hbm_to_vmem [thread:$0]  %s280_s0, 512, %s20_s10, [#allocation3], %s225_s19, %s225_s19, %s226_s20  }
  0x13   :  { %s227_s23 = smov [#allocation5]   ;;  %s174_s27 = scalar_lea.hbm %s281_s1, 512 }
  0x14   :  { %s35_s24 = sshll.u32 %s227_s23, 4  ;;  %p175_p8 = scmp.ne.s32.totalorder %s281_s1, %s174_s27  ;;  %s36_s24 = int_to_ptr.vmem [resolvable:$true] %s35_s24 }
  0x15   :  { %p178_p9 = scmp.lt.u32.totalorder %s174_s27, %s281_s1 }
  0x17   :  { %p180_p10 = pnand %p178_p9, %p175_p8 }
  0x19   :  { %183 = shalt.err (!%p180_p10)
}
  0x1a   :  { %s184_s4 = scalar_lea.vmem %s36_s24, 512  ;;  %p189_p12 = scmp.lt.s32.totalorder %s36_s24, %s36_s24 }
  0x1b   :  { %p185_p11 = scmp.ne.s32.totalorder %s36_s24, %s184_s4  ;;  %p190_p13 = scmp.lt.s32.totalorder %s184_s4, %s184_s4 }
  0x1d   :  { %p191_p0 = por %p190_p13, %p189_p12 }
  0x1f   :  { %p192_p1 = pnand %p191_p0, %p185_p11 }
  0x21   :  { %195 = shalt.err (!%p192_p1)
}
  0x22   :  { %41 = dma.hbm_to_vmem [thread:$0]  %s281_s1, 512, %s36_s24, [#allocation6], %s225_s19, %s225_s19, %s226_s20  }
  0x23   :  { %218 = dma.done.wait [#allocation3], 512  }
  0x24   :  { %219 = vsyncadd [#allocation3], 4294966784 }
  0x25   :  { %220 = dma.done.wait [#allocation6], 512  }
  0x26   :  { %221 = vsyncadd [#allocation6], 4294966784  ;;  %v96_v0 = vlaneseq  ;;  %v57_v2 = vld [vmem:[#allocation2] sm:$0xff]  ;;  %v58_v3 = vld [vmem:[#allocation2 + $0x8] sm:$0xff]  ;;  %s228_s1 = smov [#allocation7]  }
  0x27   :  { %v61_v4 = vld [vmem:[#allocation5] sm:$0xff]  ;;  %v62_v5 = vld [vmem:[#allocation5 + $0x8] sm:$0xff]  ;;  %v65_v6 = vmax.f32 %v57_v2, 0.0  ;;  %v66_v7 = vmax.f32 %v58_v3, 0.0  ;;  %s136_s6 = sshll.u32 %s228_s1, 4  ;;  %s137_s6 = int_to_ptr.vmem [resolvable:$true] %s136_s6 }
  0x28   :  { %v97_v1 = vshrl.u32 %v96_v0, 7  ;;  %v73_v8 = vmax.f32 %v61_v4, 0.0  ;;  %v74_v9 = vmax.f32 %v62_v5, 0.0  ;;  %s196_s7 = scalar_lea.vmem %s137_s6, 128  ;;  %p201_p3 = scmp.lt.s32.totalorder %s137_s6, %s137_s6 }
  0x29   :  { %v69_v10 = vmin.f32 %v65_v6, 255.0  ;;  %v70_v11 = vmin.f32 %v66_v7, 255.0  ;;  %p197_p2 = scmp.ne.s32.totalorder %s137_s6, %s196_s7  ;;  %p202_p4 = scmp.lt.s32.totalorder %s196_s7, %s196_s7 }
  0x2a   :  { %v77_v12 = vmin.f32 %v73_v8, 255.0  ;;  %v98_v13 = vadd.s32 8, %v97_v1  ;;  %v78_v14 = vmin.f32 %v74_v9, 255.0 }
  0x2b   :  { %p203_p5 = por %p202_p4, %p201_p3 }
  0x2c   :  { %v81_v15 = vsub.f32 %v69_v10, %v77_v12  ;;  %v82_v16 = vsub.f32 %v70_v11, %v78_v14  ;;  %vm107_vm0 = vcmp.lt.s32.totalorder %v98_v13, 12 }
  0x2d   :  { %p204_p6 = pnand %p203_p5, %p197_p2 }
  0x2e   :  { %v85_v17 = vmul.f32 %v81_v15, %v81_v15  ;;  %v86_v18 = vmul.f32 %v82_v16, %v82_v16 }
  0x30   :  { %v111_v19 = vsel %vm107_vm0, %v86_v18, 0.0 }
  0x31   :  { %v115_v20 = vadd.f32 %v111_v19, %v85_v17 }
  0x33   :  { %119 = vst [vmem:[#allocation7] sm:$0xff] %v115_v20 }
  0x34   :  { %207 = shalt.err (!%p204_p6)
}
  0x35   :  { %s208_s10 = scalar_lea.hbm %s282_s2, 128 }
  0x36   :  { %p209_p7 = scmp.ne.s32.totalorder %s282_s2, %s208_s10  ;;  %p212_p8 = scmp.lt.u32.totalorder %s208_s10, %s282_s2 }
  0x38   :  { %p214_p9 = pnand %p212_p8, %p209_p7 }
  0x3a   :  { %217 = shalt.err (!%p214_p9)
}
  0x3b   :  { %139 = dma.vmem_to_hbm [thread:$0]  %s137_s6, 128, %s282_s2, [#allocation4]  }
  0x3c   :  { %222 = dma.done.wait [#allocation4], 128  }
  0x3d   :  { %223 = vsyncadd [#allocation4], 4294967168 }
  0x3e   :  { %143 = vsyncpa [#allocation3], 1 }
  0x3f   :  { %144 = vsyncpa [#allocation6], 1 }
  0x40   :  { %145 = vsyncpa [#allocation4], 1 }

</bundles_post_ra>
